<compile_context>
chip_gen: v7x
topology: tpu7x:2x2x1
jax: 0.10.0
libtpu: 0.0.40
codegen_flags: <defaults>
</compile_context>

<pallas_src>
import functools

import jax
import jax.numpy as jnp
from jax.experimental import pallas as pl
from jax.experimental.pallas import tpu as pltpu


def _random_shift_kernel(pad, nb, shift_ref, x_ref, o_ref):
    # shift_ref: SMEM (2, N) int32 — row 0 = x-shift (width), row 1 = y-shift (height)
    # x_ref:     VMEM (nb, C, H, W) un-padded input block
    # o_ref:     VMEM (nb, C, H, W) output block
    b0 = pl.program_id(0) * nb
    _, c, h, w = o_ref.shape

    # iota templates shared across the nb samples (hoisted out of the loop).
    r_in = jax.lax.broadcasted_iota(jnp.int32, (h, h), 1)    # source-row index
    i_out = jax.lax.broadcasted_iota(jnp.int32, (h, h), 0)   # output-row index
    w_in = jax.lax.broadcasted_iota(jnp.int32, (w, w), 0)    # source-col index
    j_out = jax.lax.broadcasted_iota(jnp.int32, (w, w), 1)   # output-col index

    def body(s, carry):
        g = b0 + s
        sx = jnp.clip(shift_ref[0, g], 0, 2 * pad)
        sy = jnp.clip(shift_ref[1, g], 0, 2 * pad)

        xs = x_ref[s]                                         # (C, H, W)

        # Row one-hot:  R[i, r] = 1  iff  r == clamp(i + sy - pad, 0, H-1)
        rsel = (r_in == jnp.clip(i_out + sy - pad, 0, h - 1)).astype(xs.dtype)
        # Col one-hot:  Cm[k, j] = 1 iff  k == clamp(j + sx - pad, 0, W-1)
        csel = (w_in == jnp.clip(j_out + sx - pad, 0, w - 1)).astype(jnp.float32)

        rb = jnp.broadcast_to(rsel[None], (c, h, h))          # (C, I, R)
        cb = jnp.broadcast_to(csel[None], (c, w, w))          # (C, K, J)

        # t[c, i, k] = sum_r R[i, r] * xs[c, r, k]   (exact gather, 0/1 weights)
        t = jax.lax.dot_general(rb, xs, (((2,), (1,)), ((0,), (0,))),
                                preferred_element_type=jnp.float32)
        # out[c, i, j] = sum_k t[c, i, k] * Cm[k, j]
        out = jax.lax.dot_general(t, cb, (((2,), (1,)), ((0,), (0,))),
                                  preferred_element_type=jnp.float32)
        o_ref[s] = out.astype(o_ref.dtype)
        return carry

    jax.lax.fori_loop(0, nb, body, 0, unroll=True)


def _ceil_to(v, m):
    return (v + m - 1) // m * m


def _pick_nb(n, c, h, w, itemsize, budget_bytes=12 << 20, max_nb=8):
    """Largest divisor of n (<= max_nb) whose double-buffered in+out blocks plus
    f32 temporaries fit a conservative VMEM budget (accounts for (8,128) tile
    padding); among those, prefer an even grid length (v7x megacore)."""
    tile = c * _ceil_to(h, 8) * _ceil_to(w, 128) * itemsize   # one sample, one block
    tmp = 4 * c * _ceil_to(h, 8) * _ceil_to(w, 128) * 4       # f32 temporaries + one-hot slack

    def fits(cand):
        return 2 * cand * 2 * tile + tmp <= budget_bytes      # double-buffered in + out

    divisors = [d for d in range(1, min(n, max_nb) + 1) if n % d == 0 and fits(d)]
    if not divisors:
        return 1
    even_steps = [d for d in divisors if (n // d) % 2 == 0]
    return max(even_steps) if even_steps else max(divisors)


def random_shifts_aug(x, shifts, pad, nb=None):
    """x: (N, C, H, W) float; shifts: (N, 2) int32 in [0, 2*pad],
    [:, 0] = x-shift (width), [:, 1] = y-shift (height)."""
    n, c, h, w = x.shape
    assert h == w
    itemsize = jnp.dtype(x.dtype).itemsize
    if nb is None:
        nb = _pick_nb(n, c, h, w, itemsize)
    assert n % nb == 0

    # (2, N) int32 scalar-prefetch operand: long axis last -> compact SMEM footprint.
    shifts_t = jnp.transpose(shifts.astype(jnp.int32))        # row 0 = sx, row 1 = sy

    flops = 2 * n * c * (h * h * w + h * w * w)               # two 0/1-gather matmuls / sample
    bytes_accessed = 2 * n * c * h * w * itemsize + shifts_t.size * 4

    kernel = functools.partial(_random_shift_kernel, pad, nb)
    return pl.pallas_call(
        kernel,
        out_shape=jax.ShapeDtypeStruct((n, c, h, w), x.dtype),
        grid_spec=pltpu.PrefetchScalarGridSpec(
            num_scalar_prefetch=1,                            # shifts -> SMEM
            grid=(n // nb,),
            in_specs=[pl.BlockSpec((nb, c, h, w), lambda b, s: (b, 0, 0, 0))],
            out_specs=pl.BlockSpec((nb, c, h, w), lambda b, s: (b, 0, 0, 0)),
        ),
        compiler_params=pltpu.CompilerParams(
            dimension_semantics=("parallel",)),               # batch axis is embarrassingly parallel
        cost_estimate=pl.CostEstimate(flops=flops, transcendentals=0,
                                      bytes_accessed=bytes_accessed),
    )(shifts_t, x)


if __name__ == "__main__":
    key = jax.random.PRNGKey(0)
    kx, ks = jax.random.split(key)

    n, c, h, w = 2, 4, 16, 16
    pad = 4

    x = jax.random.normal(kx, (n, c, h, w), dtype=jnp.float32)
    # TODO(synk): torch.randint RNG stream is not reproducible in JAX; draw the
    # per-sample integer shifts deterministically with jax.random instead.
    shifts = jax.random.randint(ks, (n, 2), 0, 2 * pad + 1, dtype=jnp.int32)

    out = jax.block_until_ready(random_shifts_aug(x, shifts, pad))

    # Pure-JAX reference of the exact forward semantics
    # (replicate pad + integer-offset crop == grid_sample at pixel centers).
    xp = jnp.pad(x, ((0, 0), (0, 0), (pad, pad), (pad, pad)), mode="edge")
    ref = jnp.stack([
        jax.lax.dynamic_slice(xp[b], (0, shifts[b, 1], shifts[b, 0]), (c, h, w))
        for b in range(n)
    ])

    assert out.shape == (n, c, h, w) and out.dtype == x.dtype
    assert jnp.allclose(out, ref, atol=1e-5), "mismatch vs reference"
    print("KERNEL_OK")
</pallas_src>

<mosaic_0001>
module attributes {stable_mosaic.version = 11 : i64} {
  func.func @_random_shift_kernel(%arg0: i32, %arg1: memref<2x2xi32, #tpu.memory_space<smem>>, %arg2: memref<1x4x16x16xf32, #tpu.memory_space<vmem>>, %arg3: memref<1x4x16x16xf32, #tpu.memory_space<vmem>>) attributes {dimension_semantics = [#tpu.dimension_semantics<parallel>], iteration_bounds = array<i64: 2>, scalar_prefetch = 1 : i64, scratch_operands = 0 : i64, tpu.core_type = #tpu.core_type<tc>, window_params = [{transform_indices = @transform_0, window_bounds = array<i64: 1, 4, 16, 16>}, {transform_indices = @transform_1, window_bounds = array<i64: 1, 4, 16, 16>}]} {
    %c1_i32 = arith.constant 1 : i32
    %0 = arith.muli %arg0, %c1_i32 : i32
    %1 = tpu.iota {dimensions = array<i32: 1>} : vector<16x16xi32>
    %2 = tpu.iota {dimensions = array<i32: 0>} : vector<16x16xi32>
    %3 = tpu.iota {dimensions = array<i32: 0>} : vector<16x16xi32>
    %4 = tpu.iota {dimensions = array<i32: 1>} : vector<16x16xi32>
    %c0_i32 = arith.constant 0 : i32
    %5 = arith.addi %0, %c0_i32 : i32
    %c0 = arith.constant 0 : index
    %6 = arith.index_cast %5 : i32 to index
    %7 = memref.load %arg1[%c0, %6] : memref<2x2xi32, #tpu.memory_space<smem>>
    %c0_i32_0 = arith.constant 0 : i32
    %c8_i32 = arith.constant 8 : i32
    %8 = arith.maxsi %c0_i32_0, %7 : i32
    %9 = arith.minsi %c8_i32, %8 : i32
    %c1 = arith.constant 1 : index
    %10 = arith.index_cast %5 : i32 to index
    %11 = memref.load %arg1[%c1, %10] : memref<2x2xi32, #tpu.memory_space<smem>>
    %c0_i32_1 = arith.constant 0 : i32
    %c8_i32_2 = arith.constant 8 : i32
    %12 = arith.maxsi %c0_i32_1, %11 : i32
    %13 = arith.minsi %c8_i32_2, %12 : i32
    %14 = arith.index_cast %c0_i32 : i32 to index
    %c0_3 = arith.constant 0 : index
    %c0_4 = arith.constant 0 : index
    %c0_5 = arith.constant 0 : index
    %15 = vector.load %arg2[%14, %c0_3, %c0_4, %c0_5] : memref<1x4x16x16xf32, #tpu.memory_space<vmem>>, vector<1x4x16x16xf32>
    %16 = vector.shape_cast %15 : vector<1x4x16x16xf32> to vector<4x16x16xf32>
    %17 = vector.broadcast %13 : i32 to vector<16x16xi32>
    %18 = arith.addi %2, %17 : vector<16x16xi32>
    %c4_i32 = arith.constant 4 : i32
    %19 = vector.broadcast %c4_i32 : i32 to vector<16x16xi32>
    %20 = arith.subi %18, %19 : vector<16x16xi32>
    %c0_i32_6 = arith.constant 0 : i32
    %c15_i32 = arith.constant 15 : i32
    %21 = vector.broadcast %c0_i32_6 : i32 to vector<16x16xi32>
    %22 = arith.maxsi %21, %20 : vector<16x16xi32>
    %23 = vector.broadcast %c15_i32 : i32 to vector<16x16xi32>
    %24 = arith.minsi %23, %22 : vector<16x16xi32>
    %25 = arith.cmpi eq, %1, %24 : vector<16x16xi32>
    %26 = arith.extui %25 : vector<16x16xi1> to vector<16x16xi32>
    %27 = arith.sitofp %26 : vector<16x16xi32> to vector<16x16xf32>
    %28 = vector.broadcast %9 : i32 to vector<16x16xi32>
    %29 = arith.addi %4, %28 : vector<16x16xi32>
    %c4_i32_7 = arith.constant 4 : i32
    %30 = vector.broadcast %c4_i32_7 : i32 to vector<16x16xi32>
    %31 = arith.subi %29, %30 : vector<16x16xi32>
    %c0_i32_8 = arith.constant 0 : i32
    %c15_i32_9 = arith.constant 15 : i32
    %32 = vector.broadcast %c0_i32_8 : i32 to vector<16x16xi32>
    %33 = arith.maxsi %32, %31 : vector<16x16xi32>
    %34 = vector.broadcast %c15_i32_9 : i32 to vector<16x16xi32>
    %35 = arith.minsi %34, %33 : vector<16x16xi32>
    %36 = arith.cmpi eq, %3, %35 : vector<16x16xi32>
    %37 = arith.extui %36 : vector<16x16xi1> to vector<16x16xi32>
    %38 = arith.sitofp %37 : vector<16x16xi32> to vector<16x16xf32>
    %39 = vector.shape_cast %27 : vector<16x16xf32> to vector<1x16x16xf32>
    %40 = vector.shape_cast %39 : vector<1x16x16xf32> to vector<1x16x16xf32>
    %41 = vector.broadcast %40 : vector<1x16x16xf32> to vector<4x16x16xf32>
    %42 = vector.shape_cast %38 : vector<16x16xf32> to vector<1x16x16xf32>
    %43 = vector.shape_cast %42 : vector<1x16x16xf32> to vector<1x16x16xf32>
    %44 = vector.broadcast %43 : vector<1x16x16xf32> to vector<4x16x16xf32>
    %cst = arith.constant dense<0.000000e+00> : vector<4x16x16xf32>
    %45 = tpu.matmul %41, %16, %cst {dimension_numbers = #tpu.dot_dimension_numbers<[2], [1], [1], [2], [0, 0, 0, 1, 1, 2], [0], [0]>} : vector<4x16x16xf32>, vector<4x16x16xf32>, vector<4x16x16xf32> -> vector<4x16x16xf32>
    %cst_10 = arith.constant dense<0.000000e+00> : vector<4x16x16xf32>
    %46 = tpu.matmul %45, %44, %cst_10 {dimension_numbers = #tpu.dot_dimension_numbers<[2], [1], [1], [2], [0, 0, 0, 1, 1, 2], [0], [0]>} : vector<4x16x16xf32>, vector<4x16x16xf32>, vector<4x16x16xf32> -> vector<4x16x16xf32>
    %47 = arith.index_cast %c0_i32 : i32 to index
    %c0_11 = arith.constant 0 : index
    %c0_12 = arith.constant 0 : index
    %c0_13 = arith.constant 0 : index
    %48 = vector.load %arg3[%47, %c0_11, %c0_12, %c0_13] : memref<1x4x16x16xf32, #tpu.memory_space<vmem>>, vector<1x4x16x16xf32>
    %49 = vector.shape_cast %48 : vector<1x4x16x16xf32> to vector<4x16x16xf32>
    %50 = vector.shape_cast %46 : vector<4x16x16xf32> to vector<1x4x16x16xf32>
    tpu.vector_store %arg3[%47, %c0_11, %c0_12, %c0_13], %50 {strides = array<i32>} : memref<1x4x16x16xf32, #tpu.memory_space<vmem>>, vector<1x4x16x16xf32>,
    %c1_i32_14 = arith.constant 1 : i32
    return
  }
  func.func @transform_0(%arg0: i32, %arg1: memref<2x2xi32, #tpu.memory_space<smem>>) -> (i32, i32, i32, i32) {
    %c0_i32 = arith.constant 0 : i32
    %c0_i32_0 = arith.constant 0 : i32
    %c0_i32_1 = arith.constant 0 : i32
    %c0_i32_2 = arith.constant 0 : i32
    return %arg0, %c0_i32, %c0_i32_0, %c0_i32_1 : i32, i32, i32, i32
  }
  func.func @transform_1(%arg0: i32, %arg1: memref<2x2xi32, #tpu.memory_space<smem>>) -> (i32, i32, i32, i32) {
    %c0_i32 = arith.constant 0 : i32
    %c0_i32_0 = arith.constant 0 : i32
    %c0_i32_1 = arith.constant 0 : i32
    %c0_i32_2 = arith.constant 0 : i32
    return %arg0, %c0_i32, %c0_i32_0, %c0_i32_1 : i32, i32, i32, i32
  }
}

</mosaic_0001>

<bundles_post_ra>
// kernel: tpu_custom_call.1
= control target key start
LH: loop header
LB: loop body
LE: loop exit
PB: predicated region body
PF: predicated region fallthrough
CT: control target
= control target key end

     0   :  { %s1530_s0 = inlined_call_operand.hbm [shape: s32[2,2], index: 0, kind: input, shape index: {}]   ;;  %s1531_s1 = inlined_call_operand.hbm [shape: f32[2,4,16,16], index: 1, kind: input, shape index: {}]   ;;  %s1532_s2 = inlined_call_operand.hbm [shape: f32[2,4,16,16], index: 2, kind: output, shape index: {}]  }
   0x1   :  { %s1165_s11 = scalar_lea.hbm %s1530_s0, 32 }
   0x2   :  { %p1166_p0 = scmp.ne.s32.totalorder %s1530_s0, %s1165_s11  ;;  %p1169_p1 = scmp.lt.u32.totalorder %s1165_s11, %s1530_s0 }
   0x4   :  { %p1171_p2 = pnand %p1169_p1, %p1166_p0 }
   0x6   :  { %1174 = shalt.err (!%p1171_p2)  }
   0x7   :  { %s1275_s16 = smov [#allocation3]  }
   0x8   :  { %8 = dma.hbm_to_smem %s1530_s0, 32, %s1275_s16, [#allocation2] }
   0x9   :  { %1249 = dma.done.wait [#allocation2], 32 }
   0xa   :  { %1250 = vsyncadd [#allocation2], 4294967264 }
   0xb   :  { %10 = sfence }
   0xc   :  { %11 = vsyncpa [#allocation5], 0 }
   0xd   :  { %13 = vsyncpa [#allocation5 + $0x1], 0 }
   0xe   :  { %14 = vsyncpa [#allocation6], 0 }
   0xf   :  { %16 = vsyncpa [#allocation6 + $0x1], 0  ;;  %s1311_s19 = smov 0   ;;  %s1313_s20 = smov 0  }
  0x10   :  { %s1315_s21 = smov 0   ;;  %s1317_s22 = smov 0  }
  0x11 LB: > { %s1332_s0 = sadd.s32 4294967295, %s1273_s22   ;;  %s928_s23 = sadd.s32 4294967294, %s1273_s22   ;;  %s1273_s22 = sphi %s1317_s22, %s1547_s22   ;;  %s1269_s21 = sphi %s1315_s21, %s1546_s21   ;;  %s1265_s20 = sphi %s1313_s20, %s1545_s20   ;;  %s1261_s19 = sphi %s1311_s19, %s1544_s19  }
  0x12   : > { %s1336_s24 = sadd.s32 1, %s1273_s22   ;;  %s29_s25 = sadd.s32 1, %s1269_s21 }
  0x13   : > { %s26_s26 = ssub.s32 %s1273_s22, %s1336_s24  ;;  %p36_p3 = scmp.ne.s32.totalorder %s1269_s21, %s1265_s20 }
  0x14   : > { %p27_p4 = scmp.eq.s32.totalorder %s26_s26, 0  ;;  %p37_p5 = scmp.eq.s32.totalorder %s1273_s22, 0 }
  0x15   : > { %p42_p6 = scmp.ne.s32.totalorder %s1265_s20, %s1261_s19  ;;  %p43_p7 = scmp.eq.s32.totalorder %s1332_s0, 0 }
  0x16   : > { %s1348_s27 = scalar_select %p27_p4, %s1269_s21, %s29_s25  }
  0x17   : > { %p1350_p8 = por %p37_p5, %p36_p3  ;;  %p1354_p9 = por %p43_p7, %p42_p6 }
  0x18   : > { %p66_p10 = scmp.eq.s32.totalorder %s1332_s0, 1  ;;  %p72_p11 = scmp.eq.s32.totalorder %s928_s23, 1 }
  0x19   : > { %p1124_p13 = scmp.lt.s32.totalorder %s1273_s22, 2  ;;  %s92_s4 = sand.u32 1, %s1269_s21  }
  0x1a   : > { %p1361_p0 = por %p66_p10, %p36_p3  ;;  %p1365_p1 = por %p72_p11, %p42_p6 }
  0x1b   : > { %s984_s5 = sshll.u32 %s1273_s22, 10  ;;  %s931_s6 = sshll.u32 %s92_s4, 6 }
  0x1c   : > { %s1536_s30 = scalar_select %p1361_p0, 1, 0 }
  0x1d   : > { %s1537_s3 = scalar_select %p1365_p1, 1, 0 }
  0x1e   : > { %s1374_s9 = scalar_lea.hbm %s1531_s1, %s984_s5  ;;  %s96_s10 = scalar_lea.vmem [#allocation4], %s931_s6 }
  0x1f   : > { %s103_s11 = sshll.u32 %s96_s10, 4  ;;  %p1378_p2 = pnand %p1124_p13, %p1350_p8  ;;  %s1382_s11 = int_to_ptr.vmem [resolvable:$true] %s103_s11 }
  0x20   : > { %s1384_s13 = scalar_lea.sflag [#allocation5], %s92_s4  ;;  %s1175_s14 = scalar_lea.hbm %s1374_s9, 1024 }
  0x21   : > { %p1176_p3 = scmp.ne.s32.totalorder %s1374_s9, %s1175_s14  ;;  %p1177_p4 = pneg %p1378_p2 }
  0x22   : > { %s1180_s17 = scalar_lea.hbm %s1531_s1, 2048  ;;  %p1181_p7 = scmp.lt.u32.totalorder %s1374_s9, %s1531_s1 }
  0x23   : > { %p1178_p5 = pnand %p1177_p4, %p1176_p3  ;;  %p1182_p8 = scmp.lt.u32.totalorder %s1180_s17, %s1175_s14 }
  0x24   : > { %p1184_p11 = scmp.lt.u32.totalorder %s1175_s14, %s1374_s9 }
  0x25   : > { %p1179_p6 = pneg %p1178_p5  ;;  %p1183_p10 = por %p1182_p8, %p1181_p7 }
  0x27   : > { %p1185_p13 = por %p1184_p11, %p1183_p10 }
  0x29   : > { %p1186_p12 = pnand %p1185_p13, %p1179_p6 }
  0x2b   : > { %1189 = shalt.err (!%p1186_p12)
}
  0x2c   : > { %s1190_s25 = scalar_lea.vmem %s1382_s11, 1024  ;;  %s1276_s26 = smov [#allocation4]  }
  0x2d   : > { %p1191_p3 = scmp.ne.s32.totalorder %s1382_s11, %s1190_s25  ;;  %s1195_s28 = sshll.u32 %s1276_s26, 4  ;;  %s1196_s28 = int_to_ptr.vmem [resolvable:$false] %s1195_s28 }
  0x2e   : > { %s1197_s4 = scalar_lea.vmem %s1196_s28, 2048  ;;  %p1198_p0 = scmp.lt.s32.totalorder %s1382_s11, %s1196_s28 }
  0x2f   : > { %p1193_p5 = pnand %p1191_p3, %p1177_p4  ;;  %p1199_p7 = scmp.lt.s32.totalorder %s1197_s4, %s1190_s25 }
  0x31   : > { %p1194_p1 = pneg %p1193_p5  ;;  %p1200_p8 = por %p1199_p7, %p1198_p0 }
  0x33   : > { %p1201_p10 = pnand %p1200_p8, %p1194_p1 }
  0x35   : > { %1204 = shalt.err (!%p1201_p10)
}
  0x36   : > { %s1277_s5 = smov 128   ;;  %s1278_s6 = smov 8  }
  0x37   : > { %1119 = dma.hbm_to_vmem [thread:$0]  (!%p1378_p2), %s1374_s9, 1024, %s1382_s11, %s1384_s13, %s1277_s5, %s1277_s5, %s1278_s6  }
  0x38   : > { %p934_p12 = scmp.ge.s32.totalorder %s1273_s22, 1  ;;  %p111_p4 = scmp.lt.s32.totalorder %s1273_s22, 3 }
  0x3a   : > { %p112_p6 = pnand %p934_p12, %p111_p4 }
  0x3b   : > { %s1415_s7 = sand.u32 (!%p112_p6), 1, %s1265_s20  }
  0x3c   : > { %115 = sbr.rel (%p112_p6) target bundleno = 540 (0x21c), region = 24  ;;  %s935_s8 = sshll.u32 (!%p112_p6), %s1415_s7, 6 }
  0x3d   : > { %s118_s10 = scalar_lea.sflag (!%p112_p6), [#allocation5], %s1415_s7  ;;  %s121_s14 = scalar_lea.vmem (!%p112_p6), [#allocation4], %s935_s8 }
  0x43   : > { %1252 = dma.done.wait (%p1354_p9), %s118_s10, 1024  }
  0x44   : > { %1254 = vsyncadd (%p1354_p9), %s118_s10, 4294966272  ;;  %s150_s9 = sshra.s32 %s1332_s0, 7  ;;  %s155_s11 = sand.u32 127, %s1332_s0  ;;  %v140_v0 = vlaneseq  ;;  %v162_v1 = vld [vmem:[%s121_s14] sm:$0xff]  ;;  %v163_v2 = vld [vmem:[%s121_s14 + $0x8] sm:$0xff]  ;;  %vm202_vm6 = vcmask 130048  }
  0x45   : > { %s145_s12 = sld [smem:[#allocation3 + %s1332_s0]]  ;;  %s987_s13 = sshll.u32 %s150_s9, 7  ;;  %v164_v3 = vld [vmem:[%s121_s14 + $0x10] sm:$0xff]  ;;  %v1080_v4 = vpack.c.bf16 %v163_v2, %v162_v1  ;;  %v165_v5 = vld [vmem:[%s121_s14 + $0x18] sm:$0xff]  ;;  %v166_v6 = vld [vmem:[%s121_s14 + $0x20] sm:$0xff]  ;;  %v1279_v30 = vmov 0.0  }
  0x46   : > { %s988_s15 = sadd.s32 128, %s987_s13  ;;  %v167_v7 = vld [vmem:[%s121_s14 + $0x28] sm:$0xff]  ;;  %v1084_v8 = vpack.c.bf16 %v165_v5, %v164_v3  ;;  %v143_v9 = vshrl.u32 %v140_v0, 7  ;;  %v168_v11 = vld [vmem:[%s121_s14 + $0x30] sm:$0xff]  ;;  %v169_v12 = vld [vmem:[%s121_s14 + $0x38] sm:$0xff]  ;;  %v141_v14 = vand.u32 127, %v140_v0 }
  0x47   : > { %s156_s16 = sadd.s32 %s988_s15, %s155_s11  ;;  %v1088_v10 = vpack.c.bf16 %v167_v7, %v166_v6  ;;  %1081 = vmatprep.subr.bf16.mxu0 %v1080_v4  ;;  %v1092_v13 = vpack.c.bf16 %v169_v12, %v168_v11  ;;  %v1280_v34 = vmov 1.0|1.0   ;;  %s139_s18 = scalar_lea.vmem [#allocation7], %s935_s8 }
  0x48   : > { %s1428_s17 = sld [smem:[#allocation3 + %s156_s16]]  ;;  %1085 = vmatprep.subr.bf16.mxu1 %v1084_v8  ;;  %1083 = vmatpush3.bf16.msra.mxu0 %v1080_v4  ;;  %v144_v16 = vadd.s32 8, %v143_v9  ;;  %s855_s23 = sshll.u32 %s139_s18, 4  ;;  %s1475_s23 = int_to_ptr.vmem [resolvable:$true] %s855_s23 }
  0x49   : > { %1087 = vmatpush3.bf16.msra.mxu1 %v1084_v8  ;;  %1089 = vmatprep.subr.bf16.mxu0 %v1088_v10  ;;  %s991_s25 = sshll.u32 %s1332_s0, 10  ;;  %s842_s4 = scalar_lea.sflag [#allocation6], %s1415_s7 }
  0x4a   : > { %1093 = vmatprep.subr.bf16.mxu1 %v1092_v13  ;;  %s1482_s0 = scalar_lea.hbm %s1532_s2, %s991_s25  ;;  %s1205_s5 = scalar_lea.vmem %s1475_s23, 1024 }
  0x4b   : > { %p146_p0 = scmp.gt.s32.totalorder %s145_s12, 0  ;;  %p937_p1 = scmp.lt.s32.totalorder %s145_s12, 8 }
  0x4c   : > { %p1206_p11 = scmp.ne.s32.totalorder %s1475_s23, %s1205_s5  ;;  %p1541_p13 = scmp.ne.s32.totalorder %s1536_s30, 0 }
  0x4d   : > { %s147_s29 = scalar_select %p146_p0, %s145_s12, 0 }
  0x4e   : > { %p158_p9 = scmp.gt.s32.totalorder %s1428_s17, 0  ;;  %p943_p2 = scmp.lt.s32.totalorder %s1428_s17, 8 }
  0x4f   : > { %s1549_s29 = smov (!%p937_p1, %s147_s29), 8  ;;  %p1207_p3 = pnand %p1206_p11, %p1541_p13 }
  0x50   : > { %s1551_s17 = smov (!%p158_p9, %s1428_s17), 0  ;;  %v189_v15 = vstv %s1549_s29  ;;  %s1281_s6 = smov [#allocation7]  }
  0x51   : > { %s1553_s17 = smov (!%p943_p2, %s1551_s17), 8  ;;  %v190_v17 = vadd.s32 %v189_v15, %v141_v14  ;;  %p1208_p5 = pneg %p1207_p3 }
  0x52   : > { %v170_v18 = vstv %s1553_s17  ;;  %s1209_s8 = sshll.u32 %s1281_s6, 4  ;;  %s1210_s8 = int_to_ptr.vmem [resolvable:$false] %s1209_s8 }
  0x53   : > { %v952_v19 = vadd.s32 4294967292, %v190_v17  ;;  %v171_v20 = vadd.s32 %v170_v18, %v143_v9  ;;  %v172_v21 = vadd.s32 %v170_v18, %v144_v16  ;;  %s1211_s10 = scalar_lea.vmem %s1210_s8, 2048  ;;  %p1212_p7 = scmp.lt.s32.totalorder %s1475_s23, %s1210_s8 }
  0x54   : > { %p1213_p8 = scmp.lt.s32.totalorder %s1211_s10, %s1205_s5 }
  0x55   : > { %vm192_vm0 = vcmp.gt.s32.totalorder %v952_v19, 0  ;;  %v948_v22 = vadd.s32 4294967292, %v171_v20  ;;  %v949_v23 = vadd.s32 4294967292, %v172_v21 }
  0x56   : > { %v193_v24 = vsel %vm192_vm0, %v952_v19, 0  ;;  %p1214_p10 = por %p1213_p8, %p1212_p7 }
  0x57   : > { %vm194_vm1 = vcmp.lt.s32.totalorder %v193_v24, 15  ;;  %vm175_vm2 = vcmp.gt.s32.totalorder %v948_v22, 0  ;;  %vm177_vm3 = vcmp.gt.s32.totalorder %v949_v23, 0 }
  0x58   : > { %v176_v25 = vsel %vm175_vm2, %v948_v22, 0  ;;  %v178_v26 = vsel %vm177_vm3, %v949_v23, 0  ;;  %v195_v27 = vsel %vm194_vm1, %v193_v24, 15  ;;  %p1215_p12 = pnand %p1214_p10, %p1208_p5 }
  0x59   : > { %vm179_vm4 = vcmp.lt.s32.totalorder %v176_v25, 15  ;;  %vm181_vm5 = vcmp.lt.s32.totalorder %v178_v26, 15  ;;  %vm196_vm9 = vcmp.eq.s32.totalorder %v143_v9, %v195_v27  ;;  %vm197_vm10 = vcmp.eq.s32.totalorder %v144_v16, %v195_v27 }
  0x5a   : > { %v180_v28 = vsel %vm179_vm4, %v176_v25, 15  ;;  %v182_v29 = vsel %vm181_vm5, %v178_v26, 15  ;;  %vm1437_vm11 = vmpackc.low %vm197_vm10, %vm196_vm9 }
  0x5b   : > { %vm183_vm7 = vcmp.eq.s32.totalorder %v141_v14, %v180_v28  ;;  %vm184_vm8 = vcmp.eq.s32.totalorder %v141_v14, %v182_v29 }
  0x5c   : > { %v950_v31 = vsel %vm183_vm7, 1.0, %v1279_v30  ;;  %v951_v32 = vsel %vm184_vm8, 1.0, %v1279_v30 }
  0x5d   : > { %1028 = vmatprep.mubr.msk.f32.mxu0 %vm202_vm6, %v950_v31  ;;  %1035 = vmatprep.mubr.msk.f32.mxu1 %vm202_vm6, %v950_v31 }
  0x5e   : > { %1029 = vmatmul.mubr.msk.f32.vlgmr.msra.gmra.mrb[0].mxu0 %vm202_vm6, %v951_v32  ;;  %1036 = vmatmul.mubr.msk.f32.vlgmr.msra.gmra.mrb[0].mxu1 %vm202_vm6, %v951_v32 }
  0x5f   : > { %1091 = vmatpush3.bf16.msra.mxu0 %v1088_v10  ;;  %1095 = vmatpush3.bf16.msra.mxu1 %v1092_v13 }
  0x60   : > { %1042 = vmatprep.mubr.msk.f32.mxu0 %vm202_vm6, %v950_v31  ;;  %1049 = vmatprep.mubr.msk.f32.mxu1 %vm202_vm6, %v950_v31 }
  0x61   : > { %1097 = vmatprep.subr.msk.bf16.mxu0 %vm1437_vm11, %v1280_v34  ;;  %1101 = vmatprep.subr.msk.bf16.mxu1 %vm1437_vm11, %v1280_v34 }
  0x62   : > { %1043 = vmatmul.mubr.msk.f32.vlgmr.msra.gmra.mrb[2].mxu0 %vm202_vm6, %v951_v32  ;;  %1050 = vmatmul.mubr.msk.f32.vlgmr.msra.gmra.mrb[2].mxu1 %vm202_vm6, %v951_v32 }
  0x63   : > { %1099 = vmatpush3.bf16.msk.msra.mxu0 %vm1437_vm11, %v1280_v34  ;;  %1103 = vmatpush3.bf16.msk.msra.mxu1 %vm1437_vm11, %v1280_v34 }
  0x64   : > { %1105 = vmatprep.subr.msk.bf16.mxu0 %vm1437_vm11, %v1280_v34  ;;  %1109 = vmatprep.subr.msk.bf16.mxu1 %vm1437_vm11, %v1280_v34 }
 0x131   : > { %v1030_v35 = vpop.f32.mrb[0].mxu0  ;;  %v1037_v36 = vpop.f32.mrb[0].mxu1 }
 0x132   : > { %v275_v37 = vpop.f32.mrb[1].mxu0  ;;  %v350_v38 = vpop.f32.mrb[1].mxu1 }
 0x133   : > { %1056 = vmatprep.mubr.msk.f32.mxu0 %vm202_vm6, %v275_v37  ;;  %1063 = vmatprep.mubr.msk.f32.mxu1 %vm202_vm6, %v350_v38 }
 0x134   : > { %1057 = vmatmul.mubr.msk.f32.vlgmr.msra.gmra.mrb[4].mxu0 %vm202_vm6, %v1030_v35  ;;  %1064 = vmatmul.mubr.msk.f32.vlgmr.msra.gmra.mrb[4].mxu1 %vm202_vm6, %v1037_v36 }
 0x135   : > { %1107 = vmatpush3.bf16.msk.msra.mxu0 %vm1437_vm11, %v1280_v34  ;;  %1111 = vmatpush3.bf16.msk.msra.mxu1 %vm1437_vm11, %v1280_v34  ;;  %v1044_v39 = vpop.f32.mrb[2].mxu0  ;;  %v1051_v40 = vpop.f32.mrb[2].mxu1 }
 0x136   : > { %v425_v41 = vpop.f32.mrb[3].mxu0  ;;  %v500_v42 = vpop.f32.mrb[3].mxu1 }
 0x137   : > { %1070 = vmatprep.mubr.msk.f32.mxu0 %vm202_vm6, %v425_v41  ;;  %1077 = vmatprep.mubr.msk.f32.mxu1 %vm202_vm6, %v500_v42 }
 0x138   : > { %1071 = vmatmul.mubr.msk.f32.vlgmr.msra.gmra.mrb[6].mxu0 %vm202_vm6, %v1044_v39  ;;  %1078 = vmatmul.mubr.msk.f32.vlgmr.msra.gmra.mrb[6].mxu1 %vm202_vm6, %v1051_v40 }
 0x207   : > { %v1058_v43 = vpop.f32.mrb[4].mxu0  ;;  %v1065_v44 = vpop.f32.mrb[4].mxu1 }
 0x208   : > { %834 = vst.msk [vmem:[%s139_s18 + $0x8] sm:$0xff] %vm202_vm6, %v1058_v43  ;;  %836 = vst.msk [vmem:[%s139_s18 + $0x18] sm:$0xff] %vm202_vm6, %v1065_v44  ;;  %v581_v45 = vpop.f32.mrb[5].mxu0  ;;  %v662_v46 = vpop.f32.mrb[5].mxu1 }
 0x209   : > { %833 = vst.msk [vmem:[%s139_s18] sm:$0xff] %vm202_vm6, %v581_v45  ;;  %835 = vst.msk [vmem:[%s139_s18 + $0x10] sm:$0xff] %vm202_vm6, %v662_v46 }
 0x20b   : > { %v1072_v47 = vpop.f32.mrb[6].mxu0  ;;  %v1079_v48 = vpop.f32.mrb[6].mxu1 }
 0x20c   : > { %838 = vst.msk [vmem:[%s139_s18 + $0x28] sm:$0xff] %vm202_vm6, %v1072_v47  ;;  %840 = vst.msk [vmem:[%s139_s18 + $0x38] sm:$0xff] %vm202_vm6, %v1079_v48  ;;  %v743_v49 = vpop.f32.mrb[7].mxu0  ;;  %v824_v50 = vpop.f32.mrb[7].mxu1 }
 0x20d   : > { %837 = vst.msk [vmem:[%s139_s18 + $0x20] sm:$0xff] %vm202_vm6, %v743_v49  ;;  %839 = vst.msk [vmem:[%s139_s18 + $0x30] sm:$0xff] %vm202_vm6, %v824_v50 }
 0x20e   : > { %1218 = shalt.err (!%p1215_p12)
}
 0x20f   : > { %s1219_s14 = scalar_lea.hbm %s1482_s0, 1024  ;;  %s1223_s12 = scalar_lea.hbm %s1532_s2, 2048 }
 0x210   : > { %p1220_p4 = scmp.ne.s32.totalorder %s1482_s0, %s1219_s14  ;;  %p1224_p1 = scmp.lt.u32.totalorder %s1482_s0, %s1532_s2 }
 0x211   : > { %p1225_p9 = scmp.lt.u32.totalorder %s1223_s12, %s1219_s14  ;;  %p1227_p11 = scmp.lt.u32.totalorder %s1219_s14, %s1482_s0 }
 0x212   : > { %p1221_p6 = pnand %p1220_p4, %p1541_p13 }
 0x213   : > { %p1226_p2 = por %p1225_p9, %p1224_p1 }
 0x214   : > { %p1222_p0 = pneg %p1221_p6 }
 0x215   : > { %p1228_p3 = por %p1227_p11, %p1226_p2 }
 0x217   : > { %p1229_p5 = pnand %p1228_p3, %p1222_p0 }
 0x219   : > { %1232 = shalt.err (!%p1229_p5)
}
 0x21a   : > { %s1282_s16 = smov 128   ;;  %s1283_s17 = smov 8  }
 0x21b   : > { %1114 = dma.vmem_to_hbm [thread:$0]  (%p1541_p13), %s1475_s23, 1024, %s1482_s0, %s842_s4, %s1282_s16, %s1282_s16, %s1283_s17  }
 0x21c PF: > { %s870_s29 = sand.u32 1, %s1261_s19   ;;  %p1542_p7 = scmp.ne.s32.totalorder %s1537_s3, 0 }
 0x21d   : > { %p1543_p8 = scmp.ge.s32.totalorder %s1273_s22, 2  ;;  %s871_s18 = scalar_lea.sflag [#allocation6], %s870_s29 }
 0x21f   : > { %p1121_p10 = pnand %p1543_p8, %p1542_p7 }
 0x221   : > { %1256 = dma.done.wait (!%p1121_p10), %s871_s18, 1024  }
 0x222   : > { %1258 = vsyncadd (!%p1121_p10), %s871_s18, 4294966272  ;;  %p19_p12 = scmp.ge.s32.totalorder %s1336_s24, 4   ;;  %s1544_s19 = smov %s1265_s20 }
 0x223   : > { %s1545_s20 = smov %s1269_s21  ;;  %s1546_s21 = smov %s1348_s27 }
 0x224   : > { %s1547_s22 = smov %s1336_s24  ;;  %21 = sbr.rel (!%p19_p12) target bundleno = 17 (0x11), region = 69 }
 0x22b   :  { %876 = vsyncpa [#allocation5], 1 }
 0x22c   :  { %878 = vsyncpa [#allocation5 + $0x1], 1 }
 0x22d   :  { %879 = vsyncpa [#allocation6], 1 }
 0x22e   :  { %881 = vsyncpa [#allocation6 + $0x1], 1 }

</bundles_post_ra>
